<compile_context>
chip_gen: v7x
topology: tpu7x:2x2x1
jax: 0.10.0
libtpu: 0.0.40
codegen_flags: <defaults>
</compile_context>

<pallas_src>
import functools

import jax
import jax.numpy as jnp
from jax.experimental import pallas as pl
from jax.experimental.pallas import tpu as pltpu


def _repeat_vector_kernel(x_ref, o_ref, *, n, f, reps_per_chunk):
    # x_ref: (TB, F) block of input rows.
    # o_ref: (TB, n*F) flattened output block (same bytes as (TB, n, F)).
    row = x_ref[...]                                   # (TB, F)
    # Build a lane-dense chunk of `reps_per_chunk` repeats, then store it
    # repeatedly with static (zero-cost) ref slices.
    chunk = jnp.tile(row, (1, reps_per_chunk))         # (TB, reps_per_chunk*F)
    cw = reps_per_chunk * f
    n_full = n // reps_per_chunk
    for c in range(n_full):                            # static unrolled stores
        o_ref[:, c * cw:(c + 1) * cw] = chunk
    rem = n - n_full * reps_per_chunk
    if rem:
        o_ref[:, n_full * cw:] = chunk[:, : rem * f]


def repeat_vector(x: jax.Array, n: int) -> jax.Array:
    """Equivalent of RepeatVector(n)(x) for a 2D (batch, features) input."""
    assert x.ndim == 2, "RepeatVector kernel expects a 2D (batch, features) input"
    B, F = x.shape
    itemsize = jnp.dtype(x.dtype).itemsize

    # --- choose batch tile TB -------------------------------------------------
    # Sublane packing: f32 -> 8, bf16 -> 16, int8 -> 32 rows per packed vreg.
    sub = 8 * max(1, 4 // itemsize)
    out_row_bytes = n * F * itemsize
    # Target ~4 MiB output block per buffer (double-buffered by the pipeline).
    target_out_block_bytes = 4 * 1024 * 1024
    tb = max(1, target_out_block_bytes // max(1, out_row_bytes))
    tb = min(tb, B)
    if B >= sub:
        tb = max(sub, (tb // sub) * sub)      # multiple of the packed sublane count
    else:
        tb = B                                 # tiny batch: block == full batch dim

    grid = (pl.cdiv(B, tb),)

    # --- choose in-kernel repeat chunk ---------------------------------------
    # Keep each materialized chunk small (<= ~64 KiB) but lane-dense (>= 128 lanes).
    budget_elems = (64 * 1024) // itemsize
    reps_budget = max(1, budget_elems // max(1, tb * F))
    reps_lane = -(-128 // F)                   # ceil(128 / F)
    reps_per_chunk = min(n, max(reps_budget, reps_lane))

    # --- VMEM budget ----------------------------------------------------------
    in_block_bytes = tb * F * itemsize
    out_block_bytes = tb * n * F * itemsize
    # 2x double-buffering for input and output, plus headroom; cap for v7x (64 MiB).
    vmem_limit = int(min(48 * 1024 * 1024,
                         max(4 * 1024 * 1024,
                             3 * (in_block_bytes + out_block_bytes))))

    kernel = functools.partial(
        _repeat_vector_kernel, n=n, f=F, reps_per_chunk=reps_per_chunk)

    out_flat = pl.pallas_call(
        kernel,
        out_shape=jax.ShapeDtypeStruct((B, n * F), x.dtype),
        grid_spec=pltpu.PrefetchScalarGridSpec(
            num_scalar_prefetch=0,
            grid=grid,
            in_specs=[pl.BlockSpec((tb, F), lambda b: (b, 0))],
            out_specs=pl.BlockSpec((tb, n * F), lambda b: (b, 0)),
        ),
        compiler_params=pltpu.CompilerParams(
            dimension_semantics=("parallel",),
            vmem_limit_bytes=vmem_limit,
        ),
    )(x)

    # Row-major (B, n*F) has identical bytes to (B, n, F): free metadata reshape.
    return out_flat.reshape(B, n, F)


if __name__ == "__main__":
    key = jax.random.PRNGKey(0)
    batch, features, n = 2, 32, 8
    x = jax.random.normal(key, (batch, features), dtype=jnp.float32)

    out = repeat_vector(x, n)
    jax.block_until_ready(out)

    # Reference: unsqueeze + repeat along axis 1.
    ref = jnp.broadcast_to(x[:, None, :], (batch, n, features))
    assert out.shape == (batch, n, features), out.shape
    assert out.dtype == x.dtype
    assert jnp.array_equal(out, ref)

    print("KERNEL_OK")
</pallas_src>

<mosaic_0001>
module attributes {stable_mosaic.version = 11 : i64} {
  func.func @_repeat_vector_kernel(%arg0: i32, %arg1: memref<2x32xf32, #tpu.memory_space<vmem>>, %arg2: memref<2x256xf32, #tpu.memory_space<vmem>>) attributes {dimension_semantics = [#tpu.dimension_semantics<parallel>], iteration_bounds = array<i64: 1>, scalar_prefetch = 0 : i64, scratch_operands = 0 : i64, tpu.core_type = #tpu.core_type<tc>, window_params = [{transform_indices = @transform_0, window_bounds = array<i64: 2, 32>}, {transform_indices = @transform_1, window_bounds = array<i64: 2, 256>}]} {
    %c0 = arith.constant 0 : index
    %c0_0 = arith.constant 0 : index
    %0 = vector.load %arg1[%c0, %c0_0] : memref<2x32xf32, #tpu.memory_space<vmem>>, vector<2x32xf32>
    %1 = tpu.concatenate %0, %0, %0, %0, %0, %0, %0, %0 in 1 : vector<2x32xf32>, vector<2x32xf32>, vector<2x32xf32>, vector<2x32xf32>, vector<2x32xf32>, vector<2x32xf32>, vector<2x32xf32>, vector<2x32xf32> -> vector<2x256xf32>
    %c0_1 = arith.constant 0 : index
    %c0_2 = arith.constant 0 : index
    %2 = vector.load %arg2[%c0_1, %c0_2] : memref<2x256xf32, #tpu.memory_space<vmem>>, vector<2x256xf32>
    tpu.vector_store %arg2[%c0_1, %c0_2], %1 {strides = array<i32>} : memref<2x256xf32, #tpu.memory_space<vmem>>, vector<2x256xf32>,
    return
  }
  func.func @transform_0(%arg0: i32) -> (i32, i32) {
    %c0_i32 = arith.constant 0 : i32
    %c0_i32_0 = arith.constant 0 : i32
    return %arg0, %c0_i32 : i32, i32
  }
  func.func @transform_1(%arg0: i32) -> (i32, i32) {
    %c0_i32 = arith.constant 0 : i32
    %c0_i32_0 = arith.constant 0 : i32
    return %arg0, %c0_i32 : i32, i32
  }
}

</mosaic_0001>

<bundles_post_ra>
// kernel: tpu_custom_call.1
= control target key start
LH: loop header
LB: loop body
LE: loop exit
PB: predicated region body
PF: predicated region fallthrough
CT: control target
= control target key end

     0   :  { %6 = vsyncpa [#allocation3], 0  ;;  %s157_s0 = inlined_call_operand.hbm [shape: f32[2,32], index: 0, kind: input, shape index: {}]   ;;  %s158_s1 = inlined_call_operand.hbm [shape: f32[2,256], index: 1, kind: output, shape index: {}]  }
   0x1   :  { %7 = vsyncpa [#allocation4], 0  ;;  %s118_s6 = smov [#allocation2]   ;;  %s70_s10 = scalar_lea.hbm %s157_s0, 32 }
   0x2   :  { %s14_s7 = sshll.u32 %s118_s6, 4  ;;  %p71_p0 = scmp.ne.s32.totalorder %s157_s0, %s70_s10  ;;  %s15_s7 = int_to_ptr.vmem [resolvable:$true] %s14_s7 }
   0x3   :  { %p74_p1 = scmp.lt.u32.totalorder %s70_s10, %s157_s0 }
   0x5   :  { %p76_p2 = pnand %p74_p1, %p71_p0 }
   0x7   :  { %79 = shalt.err (!%p76_p2)
}
   0x8   :  { %s80_s15 = scalar_lea.vmem %s15_s7, 32  ;;  %p85_p4 = scmp.lt.s32.totalorder %s15_s7, %s15_s7 }
   0x9   :  { %p81_p3 = scmp.ne.s32.totalorder %s15_s7, %s80_s15  ;;  %p86_p5 = scmp.lt.s32.totalorder %s80_s15, %s80_s15 }
   0xb   :  { %p87_p6 = por %p86_p5, %p85_p4 }
   0xd   :  { %p88_p7 = pnand %p87_p6, %p81_p3 }
   0xf   :  { %91 = shalt.err (!%p88_p7)
}
  0x10   :  { %17 = dma.hbm_to_vmem [thread:$0]  %s157_s0, 32, %s15_s7, [#allocation3]  }
  0x11   :  { %114 = dma.done.wait [#allocation3], 32  }
  0x12   :  { %115 = vsyncadd [#allocation3], 4294967264  ;;  %v21_v0 = vld [vmem:[#allocation2] sm:$0x3]  ;;  %s119_s18 = smov 32   ;;  %s120_s19 = smov 96  }
  0x13   :  { %23 = vrot.lane.b32.xlu0 %v21_v0, %s119_s18  ;;  %29 = vrot.lane.b32.xlu1 %v21_v0, %s120_s19  ;;  %s121_s20 = smov 64   ;;  %vm32_vm0 = vcmask 261120   ;;  %vm34_vm1 = vcmask 523264   ;;  %vm36_vm2 = vcmask 785408   ;;  %s122_s21 = smov [#allocation5]  }
  0x14   :  { %s55_s22 = sshll.u32 %s122_s21, 4  ;;  %s56_s22 = int_to_ptr.vmem [resolvable:$true] %s55_s22 }
  0x15   :  { %s92_s0 = scalar_lea.vmem %s56_s22, 64  ;;  %p97_p9 = scmp.lt.s32.totalorder %s56_s22, %s56_s22 }
  0x16   :  { %p93_p8 = scmp.ne.s32.totalorder %s56_s22, %s92_s0  ;;  %p98_p10 = scmp.lt.s32.totalorder %s92_s0, %s92_s0 }
  0x17   :  { %26 = vrot.lane.b32.xlu0 %v21_v0, %s121_s20 }
  0x18   :  { %p99_p11 = por %p98_p10, %p97_p9 }
  0x1a   :  { %p100_p12 = pnand %p99_p11, %p93_p8 }
  0x85   :  { %v24_v1 = vpop.permute.xlu0 %23  ;;  %v30_v2 = vpop.permute.xlu1 %29 }
  0x86   :  { %v33_v3 = vsel %vm32_vm0, %v21_v0, %v24_v1 }
  0x89   :  { %v27_v4 = vpop.permute.xlu0 %26 }
  0x8a   :  { %v35_v5 = vsel %vm34_vm1, %v33_v3, %v27_v4 }
  0x8b   :  { %v37_v6 = vsel %vm36_vm2, %v35_v5, %v30_v2 }
  0x8c   :  { %v39_v7 = vcombine.low %v37_v6, %v37_v6 }
  0x8e   :  { %64 = vst.sshfl [vmem:[#allocation5] sm:$0x33 pattern:$0x76325410] %v39_v7 }
  0x8f   :  { %103 = shalt.err (!%p100_p12)
}
  0x90   :  { %s104_s25 = scalar_lea.hbm %s158_s1, 64 }
  0x91   :  { %p105_p13 = scmp.ne.s32.totalorder %s158_s1, %s104_s25  ;;  %p108_p0 = scmp.lt.u32.totalorder %s104_s25, %s158_s1 }
  0x93   :  { %p110_p1 = pnand %p108_p0, %p105_p13 }
  0x95   :  { %113 = shalt.err (!%p110_p1)
}
  0x96   :  { %58 = dma.vmem_to_hbm [thread:$0]  %s56_s22, 64, %s158_s1, [#allocation4]  }
  0x97   :  { %116 = dma.done.wait [#allocation4], 64  }
  0x98   :  { %117 = vsyncadd [#allocation4], 4294967232 }
  0x99   :  { %62 = vsyncpa [#allocation3], 1 }
  0x9a   :  { %63 = vsyncpa [#allocation4], 1 }

</bundles_post_ra>
